<compile_context>
chip_gen: v7x
topology: tpu7x:2x2x1
jax: 0.10.0
libtpu: 0.0.40
codegen_flags: <defaults>
</compile_context>

<pallas_src>
import functools

import jax
import jax.numpy as jnp
from jax import lax
from jax.experimental import pallas as pl
from jax.experimental.pallas import tpu as pltpu


def _round_up(x, m):
    return ((x + m - 1) // m) * m


# ----------------------------------------------------------------------------
# Pallas kernel: fused (1x1 conv -> folded BN -> ReLU)* -> running max over K
# ----------------------------------------------------------------------------
def _mlp_max_kernel(x_ref, *args, n_layers, fuse_transpose):
    """x_ref : (TILE_S, K_CHUNK, Cin)  f32   (batch / s-tile dims squeezed)
       params: n_layers x [w bf16 (Ci, Co_pad)  (BN scale folded in),
                           shift f32 (1, Co_pad)]
       out   : (Cout_pad, TILE_S) f32 if fuse_transpose else (TILE_S, Cout_pad)
       acc   : (TILE_S, Cout_pad) f32 scratch -- running max over K chunks
    """
    params = args[:2 * n_layers]
    out_ref = args[2 * n_layers]
    acc_ref = args[2 * n_layers + 1]

    k_idx = pl.program_id(2)

    @pl.when(k_idx == 0)
    def _init():
        acc_ref[...] = jnp.full(acc_ref.shape, -jnp.inf, dtype=acc_ref.dtype)

    ts, kc, cin = x_ref.shape
    # (TILE_S, K_CHUNK, Cin) -> (TILE_S*K_CHUNK, Cin); bf16 cast happens here
    # instead of in a separate whole-array XLA pass over HBM.
    h = x_ref[...].reshape(ts * kc, cin).astype(jnp.bfloat16)
    for i in range(n_layers):
        w = params[2 * i][...]                                  # bf16 (Ci, Co)
        shift = params[2 * i + 1][...]                          # f32  (1, Co)
        acc = jnp.dot(h, w, preferred_element_type=jnp.float32)   # MXU, f32 acc
        acc = jnp.maximum(acc + shift, 0.0)                     # scale folded in w
        h = acc.astype(jnp.bfloat16) if i + 1 < n_layers else acc

    co = h.shape[-1]
    pooled = jnp.max(h.reshape(ts, kc, co), axis=1)             # (TILE_S, Co)
    acc_ref[...] = jnp.maximum(acc_ref[...], pooled)

    @pl.when(k_idx == pl.num_programs(2) - 1)
    def _finalize():
        res = acc_ref[...]
        if fuse_transpose:
            out_ref[...] = res.T.astype(out_ref.dtype)          # (Co, TILE_S)
        else:
            out_ref[...] = res.astype(out_ref.dtype)            # (TILE_S, Co)


def _choose_tiling(S, K, cin, pdims, vmem_budget):
    """Pick (tile_s, k_chunk, fuse_transpose) bounded by a per-tile VMEM budget."""
    n_layers = len(pdims) - 1
    cout_pad = pdims[-1]
    # Bytes per (s, k) row live at once: f32 input block (double buffered) +
    # worst-case per-layer intermediate (bf16 h + f32 acc).
    per_row = cin * 4 * 2 + max(
        (cin if i == 0 else pdims[i]) * 2 + pdims[i + 1] * 4
        for i in range(n_layers))

    def fixed(ts):
        return ts * cout_pad * 4 * 3        # acc scratch + double-buffered output

    def shrink_k(ts):
        kc = K
        while ts * kc * per_row + fixed(ts) > vmem_budget and kc % 16 == 0:
            kc //= 2
        return kc

    if S % 128 != 0:
        # Small / ragged S (incl. group_all): single S tile, store (S, Cout_pad)
        # with Cout_pad (multiple of 128) as the lane dim -> lane-dense stores;
        # the tiny transpose happens in the wrapper instead of the kernel.
        return S, shrink_k(S), False

    for ts in (512, 256, 128):
        if S % ts:
            continue
        kc = shrink_k(ts)
        if ts * kc * per_row + fixed(ts) <= vmem_budget:
            return ts, kc, True
    return 128, shrink_k(128), True


def mlp_and_max(new_points, layer_params):
    """new_points: (B, S, K, Cin) f32 -> (B, Cout, S) f32 (channels-first)."""
    B, S, K, Cin = new_points.shape
    n_layers = len(layer_params)
    cout = layer_params[-1][0].shape[1]

    # Only weight / intermediate channel dims are padded to lane-dense multiples
    # of 128; the activation input keeps its real Cin in HBM (no 13-18x input
    # DMA inflation).  Padded weight rows/cols are zero so padded channels stay
    # exactly 0 through ReLU / max.
    pdims = [Cin] + [_round_up(w.shape[1], 128) for (w, _, _) in layer_params]
    cout_pad = pdims[-1]

    padded_params = []
    for i, (w, scale, shift) in enumerate(layer_params):
        ci, co = w.shape
        pci = Cin if i == 0 else pdims[i]
        pco = pdims[i + 1]
        w_fold = w * scale                      # fold BN scale into the weights
        w_p = jnp.zeros((pci, pco), jnp.bfloat16).at[:ci, :co].set(
            w_fold.astype(jnp.bfloat16))
        shift_p = jnp.zeros((1, pco), jnp.float32).at[:, :co].set(shift)
        padded_params.extend((w_p, shift_p))

    # Chip-aware VMEM budget (v5e/v6e: 128 MiB, v7x: 64 MiB physical VMEM).
    try:
        vmem_cap = int(pltpu.get_tpu_info().vmem_capacity_bytes)
    except Exception:
        vmem_cap = 64 * 1024 * 1024
    tile_s, k_chunk, fuse_t = _choose_tiling(S, K, Cin, pdims, vmem_cap // 4)
    n_s_tiles = S // tile_s
    n_k_chunks = K // k_chunk

    in_specs = [pl.BlockSpec((pl.Squeezed(), tile_s, k_chunk, Cin),
                             lambda b, s, k: (b, s, k, 0))]
    # TODO(synk): single-buffer the constant-index weight/shift operands
    # (pipeline_mode=pl.Buffered(1)) to free their double-buffer VMEM reservation.
    for p in padded_params:
        in_specs.append(
            pl.BlockSpec(p.shape, lambda b, s, k, nd=p.ndim: (0,) * nd))

    if fuse_t:
        out_shape = jax.ShapeDtypeStruct((B, cout_pad, S), jnp.float32)
        out_spec = pl.BlockSpec((pl.Squeezed(), cout_pad, tile_s),
                                lambda b, s, k: (b, 0, s))
    else:
        out_shape = jax.ShapeDtypeStruct((B, S, cout_pad), jnp.float32)
        out_spec = pl.BlockSpec((pl.Squeezed(), tile_s, cout_pad),
                                lambda b, s, k: (b, s, 0))

    flops = 2 * B * S * K * sum(
        (Cin if i == 0 else pdims[i]) * pdims[i + 1] for i in range(n_layers))
    bytes_accessed = (int(new_points.size) * 4
                      + B * cout_pad * S * 4
                      + sum(int(p.size) * p.dtype.itemsize
                            for p in padded_params))

    kernel = functools.partial(_mlp_max_kernel, n_layers=n_layers,
                               fuse_transpose=fuse_t)

    out = pl.pallas_call(
        kernel,
        out_shape=out_shape,
        grid=(B, n_s_tiles, n_k_chunks),
        in_specs=in_specs,
        out_specs=out_spec,
        scratch_shapes=[pltpu.VMEM((tile_s, cout_pad), jnp.float32)],
        compiler_params=pltpu.CompilerParams(
            dimension_semantics=("parallel", "parallel", "arbitrary"),
            vmem_limit_bytes=int(min(vmem_cap * 3 // 4, 96 * 1024 * 1024))),
        cost_estimate=pl.CostEstimate(
            flops=flops, transcendentals=0, bytes_accessed=bytes_accessed),
    )(new_points, *padded_params)

    # TODO(synk): for tiny grids on v7x (e.g. group_all, small B) add a second
    # parallel split over Cout tiles so both TensorCores get work.
    if fuse_t:
        return out[:, :cout, :]
    return jnp.transpose(out[:, :, :cout], (0, 2, 1))


# ----------------------------------------------------------------------------
# Plain-JAX grouping glue (mirrors the PyTorch helpers)
# ----------------------------------------------------------------------------
def square_distance(src, dst):
    # src: (B,N,C), dst: (B,M,C) -> (B,N,M)
    return (jnp.sum(src ** 2, -1)[:, :, None]
            + jnp.sum(dst ** 2, -1)[:, None, :]
            - 2.0 * jnp.einsum('bnc,bmc->bnm', src, dst))


def index_points(points, idx):
    # points: (B,N,C), idx: (B,...) int -> (B,...,C)
    return jax.vmap(lambda p, i: p[i])(points, idx)


def farthest_point_sample(xyz, npoint, key):
    B, N, _ = xyz.shape
    distance0 = jnp.full((B, N), 1e10, jnp.float32)
    farthest0 = jax.random.randint(key, (B,), 0, N, dtype=jnp.int32)
    centroids0 = jnp.zeros((B, npoint), jnp.int32)
    batch = jnp.arange(B)

    def body(i, carry):
        distance, farthest, centroids = carry
        centroids = centroids.at[:, i].set(farthest)
        centroid = xyz[batch, farthest][:, None, :]            # (B,1,3)
        dist = jnp.sum((xyz - centroid) ** 2, -1)
        distance = jnp.minimum(distance, dist)
        farthest = jnp.argmax(distance, axis=-1).astype(jnp.int32)
        return distance, farthest, centroids

    _, _, centroids = lax.fori_loop(
        0, npoint, body, (distance0, farthest0, centroids0))
    return centroids                                           # (B, npoint)


def query_ball_point(radius, nsample, xyz, new_xyz):
    B, N, _ = xyz.shape
    S = new_xyz.shape[1]
    group_idx = jnp.broadcast_to(jnp.arange(N, dtype=jnp.int32), (B, S, N))
    sqrdists = square_distance(new_xyz, xyz)
    group_idx = jnp.where(sqrdists > radius ** 2, N, group_idx)
    group_idx = jnp.sort(group_idx, axis=-1)[:, :, :nsample]
    group_first = jnp.broadcast_to(group_idx[:, :, :1], group_idx.shape)
    return jnp.where(group_idx == N, group_first, group_idx)


def sample_and_group(npoint, radius, nsample, xyz, points, fps_key):
    B, N, C = xyz.shape
    fps_idx = farthest_point_sample(xyz, npoint, fps_key)        # (B,S)
    new_xyz = index_points(xyz, fps_idx)                         # (B,S,3)
    idx = query_ball_point(radius, nsample, xyz, new_xyz)        # (B,S,K)
    grouped_xyz = index_points(xyz, idx)                         # (B,S,K,3)
    grouped_xyz_norm = grouped_xyz - new_xyz[:, :, None, :]
    if points is not None:
        grouped_points = index_points(points, idx)               # (B,S,K,D)
        new_points = jnp.concatenate([grouped_xyz_norm, grouped_points], axis=-1)
    else:
        new_points = grouped_xyz_norm
    return new_xyz, new_points


def sample_and_group_all(xyz, points):
    B, N, C = xyz.shape
    new_xyz = jnp.zeros((B, 1, C), xyz.dtype)
    grouped_xyz = xyz.reshape(B, 1, N, C)
    if points is not None:
        new_points = jnp.concatenate(
            [grouped_xyz, points.reshape(B, 1, N, -1)], axis=-1)
    else:
        new_points = grouped_xyz
    return new_xyz, new_points


# ----------------------------------------------------------------------------
# Module: parameter init + forward
# ----------------------------------------------------------------------------
def init_params(key, in_channel, mlp):
    """Deterministic Conv2d(1x1)+BatchNorm2d params, folded for inference."""
    eps = 1e-5
    params = []
    last = in_channel
    for out_ch in mlp:
        key, k1, k2 = jax.random.split(key, 3)
        w = jax.random.normal(k1, (out_ch, last), jnp.float32) / jnp.sqrt(last)
        b = 0.1 * jax.random.normal(k2, (out_ch,), jnp.float32)
        gamma = 1.0 + 0.1 * jnp.cos(jnp.arange(out_ch, dtype=jnp.float32))
        beta = 0.05 * jnp.sin(jnp.arange(out_ch, dtype=jnp.float32))
        r_mean = 0.01 * jnp.arange(out_ch, dtype=jnp.float32)
        r_var = 1.0 + 0.02 * jnp.arange(out_ch, dtype=jnp.float32)
        scale = gamma / jnp.sqrt(r_var + eps)
        shift = beta + (b - r_mean) * scale
        params.append((w.T, scale.reshape(1, out_ch), shift.reshape(1, out_ch)))
        last = out_ch
    return params


def pointnet_set_abstraction(xyz, points, params, *, npoint, radius, nsample,
                             group_all, fps_key):
    """xyz: [B, 3, N], points: [B, D, N] or None
       returns new_xyz: [B, 3, S], new_points: [B, Cout, S]"""
    xyz_t = jnp.transpose(xyz, (0, 2, 1))
    points_t = None if points is None else jnp.transpose(points, (0, 2, 1))
    if group_all:
        new_xyz, new_points = sample_and_group_all(xyz_t, points_t)
    else:
        new_xyz, new_points = sample_and_group(
            npoint, radius, nsample, xyz_t, points_t, fps_key)
    feats = mlp_and_max(new_points.astype(jnp.float32), params)  # (B,Cout,S)
    return jnp.transpose(new_xyz, (0, 2, 1)), feats


def _ref_mlp_max(grouped, params):
    """Pure-JAX f32 reference of the MLP+max path. grouped: (B,S,K,Cin)."""
    B, S, K, Cin = grouped.shape
    h = grouped.reshape(B * S * K, Cin)
    for (w, scale, shift) in params:
        h = jnp.maximum(jnp.dot(h, w) * scale + shift, 0.0)
    ref = jnp.max(h.reshape(B, S, K, -1), axis=2)                # (B,S,Cout)
    return jnp.transpose(ref, (0, 2, 1))                         # (B,Cout,S)


if __name__ == "__main__":
    # --- config 1: small S (< 128) -> lane-dense (S, Cout_pad) store path ----
    B, N, D = 2, 32, 4
    npoint, radius, nsample = 8, 0.4, 8
    in_channel = 3 + D
    mlp = [16, 32]

    key = jax.random.PRNGKey(0)
    kx, kp, kfps, kparam = jax.random.split(key, 4)
    xyz = jax.random.uniform(kx, (B, 3, N), jnp.float32)          # positions
    points = jax.random.normal(kp, (B, D, N), jnp.float32)        # features
    params = init_params(kparam, in_channel, mlp)

    new_xyz, new_feat = pointnet_set_abstraction(
        xyz, points, params, npoint=npoint, radius=radius, nsample=nsample,
        group_all=False, fps_key=kfps)
    jax.block_until_ready((new_xyz, new_feat))
    assert new_xyz.shape == (B, 3, npoint)
    assert new_feat.shape == (B, mlp[-1], npoint)

    xyz_t = jnp.transpose(xyz, (0, 2, 1))
    pts_t = jnp.transpose(points, (0, 2, 1))
    _, grouped = sample_and_group(npoint, radius, nsample, xyz_t, pts_t, kfps)
    ref = _ref_mlp_max(grouped, params)
    assert jnp.allclose(new_feat, ref, rtol=5e-2, atol=5e-2), "numerics mismatch (small S)"

    # --- config 2: group_all (S=1) path --------------------------------------
    new_xyz_ga, new_feat_ga = pointnet_set_abstraction(
        xyz, points, params, npoint=None, radius=None, nsample=None,
        group_all=True, fps_key=kfps)
    jax.block_until_ready(new_feat_ga)
    assert new_feat_ga.shape == (B, mlp[-1], 1)
    grouped_ga = jnp.concatenate(
        [xyz_t.reshape(B, 1, N, 3), pts_t.reshape(B, 1, N, D)], axis=-1)
    ref_ga = _ref_mlp_max(grouped_ga, params)
    assert jnp.allclose(new_feat_ga, ref_ga, rtol=5e-2, atol=5e-2), "numerics mismatch (group_all)"

    # --- config 3: S multiple of 128 -> fused-transpose (Cout_pad, TILE_S) ---
    B2, N2, D2 = 1, 256, 4
    npoint2, radius2, nsample2 = 128, 0.4, 16
    mlp2 = [32, 64]
    k2 = jax.random.PRNGKey(1)
    kx2, kp2, kfps2, kparam2 = jax.random.split(k2, 4)
    xyz2 = jax.random.uniform(kx2, (B2, 3, N2), jnp.float32)
    points2 = jax.random.normal(kp2, (B2, D2, N2), jnp.float32)
    params2 = init_params(kparam2, 3 + D2, mlp2)

    new_xyz2, new_feat2 = pointnet_set_abstraction(
        xyz2, points2, params2, npoint=npoint2, radius=radius2,
        nsample=nsample2, group_all=False, fps_key=kfps2)
    jax.block_until_ready(new_feat2)
    assert new_feat2.shape == (B2, mlp2[-1], npoint2)
    xyz2_t = jnp.transpose(xyz2, (0, 2, 1))
    pts2_t = jnp.transpose(points2, (0, 2, 1))
    _, grouped2 = sample_and_group(npoint2, radius2, nsample2, xyz2_t, pts2_t, kfps2)
    ref2 = _ref_mlp_max(grouped2, params2)
    assert jnp.allclose(new_feat2, ref2, rtol=5e-2, atol=5e-2), "numerics mismatch (large S)"

    print("KERNEL_OK")
</pallas_src>

<mosaic_0001>
module attributes {stable_mosaic.version = 11 : i64} {
  func.func @_mlp_max_kernel(%arg0: i32, %arg1: i32, %arg2: i32, %arg3: memref<1x8x8x7xf32, #tpu.memory_space<vmem>>, %arg4: memref<7x128xbf16, #tpu.memory_space<vmem>>, %arg5: memref<1x128xf32, #tpu.memory_space<vmem>>, %arg6: memref<128x128xbf16, #tpu.memory_space<vmem>>, %arg7: memref<1x128xf32, #tpu.memory_space<vmem>>, %arg8: memref<1x8x128xf32, #tpu.memory_space<vmem>>, %arg9: memref<8x128xf32, #tpu.memory_space<vmem>>) attributes {dimension_semantics = [#tpu.dimension_semantics<parallel>, #tpu.dimension_semantics<parallel>, #tpu.dimension_semantics<arbitrary>], iteration_bounds = array<i64: 2, 1, 1>, scalar_prefetch = 0 : i64, scratch_operands = 1 : i64, tpu.core_type = #tpu.core_type<tc>, window_params = [{transform_indices = @transform_0, window_bounds = array<i64: 1, 8, 8, 7>}, {pipeline_mode = #tpu.pipeline_mode<synchronous>, transform_indices = @transform_1, window_bounds = array<i64: 7, 128>}, {pipeline_mode = #tpu.pipeline_mode<synchronous>, transform_indices = @transform_2, window_bounds = array<i64: 1, 128>}, {pipeline_mode = #tpu.pipeline_mode<synchronous>, transform_indices = @transform_3, window_bounds = array<i64: 128, 128>}, {pipeline_mode = #tpu.pipeline_mode<synchronous>, transform_indices = @transform_4, window_bounds = array<i64: 1, 128>}, {transform_indices = @transform_5, window_bounds = array<i64: 1, 8, 128>}]} {
    %c0_i32 = arith.constant 0 : i32
    %0 = arith.cmpi eq, %arg2, %c0_i32 : i32
    %1 = arith.extui %0 : i1 to i32
    %c0_i32_0 = arith.constant 0 : i32
    %2 = arith.cmpi ne, %1, %c0_i32_0 : i32
    scf.if %2 {
      %cst_22 = arith.constant 0xFF800000 : f32
      %30 = vector.broadcast %cst_22 : f32 to vector<8x128xf32>
      %c0_23 = arith.constant 0 : index
      %c0_24 = arith.constant 0 : index
      %31 = vector.load %arg9[%c0_23, %c0_24] : memref<8x128xf32, #tpu.memory_space<vmem>>, vector<8x128xf32>
      tpu.vector_store %arg9[%c0_23, %c0_24], %30 {strides = array<i32>} : memref<8x128xf32, #tpu.memory_space<vmem>>, vector<8x128xf32>,
    } else {
    }
    %c0 = arith.constant 0 : index
    %c0_1 = arith.constant 0 : index
    %c0_2 = arith.constant 0 : index
    %c0_3 = arith.constant 0 : index
    %3 = vector.load %arg3[%c0, %c0_1, %c0_2, %c0_3] : memref<1x8x8x7xf32, #tpu.memory_space<vmem>>, vector<1x8x8x7xf32>
    %4 = vector.shape_cast %3 : vector<1x8x8x7xf32> to vector<8x8x7xf32>
    %5 = vector.shape_cast %4 : vector<8x8x7xf32> to vector<64x7xf32>
    %6 = arith.truncf %5 : vector<64x7xf32> to vector<64x7xbf16>
    %c0_4 = arith.constant 0 : index
    %c0_5 = arith.constant 0 : index
    %7 = vector.load %arg4[%c0_4, %c0_5] : memref<7x128xbf16, #tpu.memory_space<vmem>>, vector<7x128xbf16>
    %c0_6 = arith.constant 0 : index
    %c0_7 = arith.constant 0 : index
    %8 = vector.load %arg5[%c0_6, %c0_7] : memref<1x128xf32, #tpu.memory_space<vmem>>, vector<1x128xf32>
    %cst = arith.constant dense<0.000000e+00> : vector<64x128xf32>
    %9 = tpu.matmul %6, %7, %cst {dimension_numbers = #tpu.dot_dimension_numbers<[1], [0], [0], [1], [0, 0, 1, 1], [], []>} : vector<64x7xbf16>, vector<7x128xbf16>, vector<64x128xf32> -> vector<64x128xf32>
    %10 = vector.broadcast %8 : vector<1x128xf32> to vector<64x128xf32>
    %11 = arith.addf %9, %10 : vector<64x128xf32>
    %cst_8 = arith.constant 0.000000e+00 : f32
    %12 = vector.broadcast %cst_8 : f32 to vector<64x128xf32>
    %13 = arith.maximumf %11, %12 : vector<64x128xf32>
    %14 = arith.truncf %13 : vector<64x128xf32> to vector<64x128xbf16>
    %c0_9 = arith.constant 0 : index
    %c0_10 = arith.constant 0 : index
    %15 = vector.load %arg6[%c0_9, %c0_10] : memref<128x128xbf16, #tpu.memory_space<vmem>>, vector<128x128xbf16>
    %c0_11 = arith.constant 0 : index
    %c0_12 = arith.constant 0 : index
    %16 = vector.load %arg7[%c0_11, %c0_12] : memref<1x128xf32, #tpu.memory_space<vmem>>, vector<1x128xf32>
    %cst_13 = arith.constant dense<0.000000e+00> : vector<64x128xf32>
    %17 = tpu.matmul %14, %15, %cst_13 {dimension_numbers = #tpu.dot_dimension_numbers<[1], [0], [0], [1], [0, 0, 1, 1], [], []>} : vector<64x128xbf16>, vector<128x128xbf16>, vector<64x128xf32> -> vector<64x128xf32>
    %18 = vector.broadcast %16 : vector<1x128xf32> to vector<64x128xf32>
    %19 = arith.addf %17, %18 : vector<64x128xf32>
    %cst_14 = arith.constant 0.000000e+00 : f32
    %20 = vector.broadcast %cst_14 : f32 to vector<64x128xf32>
    %21 = arith.maximumf %19, %20 : vector<64x128xf32>
    %22 = vector.shape_cast %21 : vector<64x128xf32> to vector<8x8x128xf32>
    %cst_15 = arith.constant dense<0xFF800000> : vector<8x128xf32>
    %23 = vector.multi_reduction <maximumf>, %22, %cst_15 [1] : vector<8x8x128xf32> to vector<8x128xf32>
    %c0_16 = arith.constant 0 : index
    %c0_17 = arith.constant 0 : index
    %24 = vector.load %arg9[%c0_16, %c0_17] : memref<8x128xf32, #tpu.memory_space<vmem>>, vector<8x128xf32>
    %25 = arith.maximumf %24, %23 : vector<8x128xf32>
    %c0_18 = arith.constant 0 : index
    %c0_19 = arith.constant 0 : index
    %26 = vector.load %arg9[%c0_18, %c0_19] : memref<8x128xf32, #tpu.memory_space<vmem>>, vector<8x128xf32>
    tpu.vector_store %arg9[%c0_18, %c0_19], %25 {strides = array<i32>} : memref<8x128xf32, #tpu.memory_space<vmem>>, vector<8x128xf32>,
    %c0_i32_20 = arith.constant 0 : i32
    %27 = arith.cmpi eq, %arg2, %c0_i32_20 : i32
    %28 = arith.extui %27 : i1 to i32
    %c0_i32_21 = arith.constant 0 : i32
    %29 = arith.cmpi ne, %28, %c0_i32_21 : i32
    scf.if %29 {
      %c0_22 = arith.constant 0 : index
      %c0_23 = arith.constant 0 : index
      %30 = vector.load %arg9[%c0_22, %c0_23] : memref<8x128xf32, #tpu.memory_space<vmem>>, vector<8x128xf32>
      %c0_24 = arith.constant 0 : index
      %c0_25 = arith.constant 0 : index
      %c0_26 = arith.constant 0 : index
      %31 = vector.load %arg8[%c0_24, %c0_25, %c0_26] : memref<1x8x128xf32, #tpu.memory_space<vmem>>, vector<1x8x128xf32>
      %32 = vector.shape_cast %31 : vector<1x8x128xf32> to vector<8x128xf32>
      %33 = vector.shape_cast %30 : vector<8x128xf32> to vector<1x8x128xf32>
      tpu.vector_store %arg8[%c0_24, %c0_25, %c0_26], %33 {strides = array<i32>} : memref<1x8x128xf32, #tpu.memory_space<vmem>>, vector<1x8x128xf32>,
    } else {
    }
    return
  }
  func.func @transform_0(%arg0: i32, %arg1: i32, %arg2: i32) -> (i32, i32, i32, i32) {
    %c0_i32 = arith.constant 0 : i32
    %c0_i32_0 = arith.constant 0 : i32
    return %arg0, %arg1, %arg2, %c0_i32 : i32, i32, i32, i32
  }
  func.func @transform_1(%arg0: i32, %arg1: i32, %arg2: i32) -> (i32, i32) {
    %c0_i32 = arith.constant 0 : i32
    %c0_i32_0 = arith.constant 0 : i32
    %c0_i32_1 = arith.constant 0 : i32
    return %c0_i32, %c0_i32_0 : i32, i32
  }
  func.func @transform_2(%arg0: i32, %arg1: i32, %arg2: i32) -> (i32, i32) {
    %c0_i32 = arith.constant 0 : i32
    %c0_i32_0 = arith.constant 0 : i32
    %c0_i32_1 = arith.constant 0 : i32
    return %c0_i32, %c0_i32_0 : i32, i32
  }
  func.func @transform_3(%arg0: i32, %arg1: i32, %arg2: i32) -> (i32, i32) {
    %c0_i32 = arith.constant 0 : i32
    %c0_i32_0 = arith.constant 0 : i32
    %c0_i32_1 = arith.constant 0 : i32
    return %c0_i32, %c0_i32_0 : i32, i32
  }
  func.func @transform_4(%arg0: i32, %arg1: i32, %arg2: i32) -> (i32, i32) {
    %c0_i32 = arith.constant 0 : i32
    %c0_i32_0 = arith.constant 0 : i32
    %c0_i32_1 = arith.constant 0 : i32
    return %c0_i32, %c0_i32_0 : i32, i32
  }
  func.func @transform_5(%arg0: i32, %arg1: i32, %arg2: i32) -> (i32, i32, i32) {
    %c0_i32 = arith.constant 0 : i32
    %c0_i32_0 = arith.constant 0 : i32
    return %arg0, %arg1, %c0_i32 : i32, i32, i32
  }
}

</mosaic_0001>

<bundles_post_ra>
// kernel: tpu_custom_call.1
= control target key start
LH: loop header
LB: loop body
LE: loop exit
PB: predicated region body
PF: predicated region fallthrough
CT: control target
= control target key end

     0   :  { %10 = vsyncpa [#allocation4], 0  ;;  %s1136_s0 = inlined_call_operand.vmem [shape: f32[2,8,8,7], index: 0, kind: input, shape index: {}]   ;;  %s1137_s1 = inlined_call_operand.vmem [shape: bf16[7,128], index: 1, kind: input, shape index: {}]   ;;  %s1138_s2 = inlined_call_operand.vmem [shape: f32[1,128], index: 2, kind: input, shape index: {}]   ;;  %s1139_s3 = inlined_call_operand.vmem [shape: bf16[128,128], index: 3, kind: input, shape index: {}]   ;;  %s1140_s4 = inlined_call_operand.vmem [shape: f32[1,128], index: 4, kind: input, shape index: {}]   ;;  %s1141_s5 = inlined_call_operand.hbm [shape: f32[2,8,128], index: 5, kind: output, shape index: {}]  }
   0x1   :  { %12 = vsyncpa [#allocation4 + $0x1], 0  ;;  %s982_s18 = smov 0   ;;  %s984_s19 = smov 0  }
   0x2   :  { %s986_s20 = smov 0   ;;  %s988_s21 = smov 0  }
   0x3   :  { %s990_s22 = smov 0   ;;  %s992_s23 = smov 0  }
   0x4 LB: > { %s712_s24 = sadd.s32 4294967295, %s948_s23   ;;  %s713_s25 = sadd.s32 4294967294, %s948_s23   ;;  %s948_s23 = sphi %s992_s23, %s18_s23   ;;  %s944_s22 = sphi %s990_s22, %s1148_s22   ;;  %s940_s21 = sphi %s988_s21, %s1147_s21   ;;  %s936_s20 = sphi %s986_s20, %s1146_s20   ;;  %s932_s19 = sphi %s984_s19, %s1145_s19   ;;  %s928_s18 = sphi %s982_s18, %s1144_s18  }
   0x5   : > { %s37_s26 = sadd.s32 1, %s944_s22  ;;  %s160_s27 = sadd.s32 1, %s936_s20 }
   0x6   : > { %p39_p0 = scmp.ge.s32.totalorder %s37_s26, 2  ;;  %p170_p1 = scmp.ne.s32.totalorder %s936_s20, %s932_s19 }
   0x7   : > { %p171_p2 = scmp.eq.s32.totalorder %s712_s24, 1  ;;  %p176_p3 = scmp.ne.s32.totalorder %s932_s19, %s928_s18 }
   0x8   : > { %s1150_s26 = smov (%p39_p0, %s37_s26), 0  ;;  %p177_p5 = scmp.eq.s32.totalorder %s713_s25, 1 }
   0x9   : > { %p1022_p4 = por %p171_p2, %p170_p1  ;;  %s155_s29 = ssub.s32 %s944_s22, %s1150_s26 }
   0xa   : > { %p716_p6 = scmp.ge.s32.totalorder %s948_s23, 1  ;;  %p158_p7 = scmp.eq.s32.totalorder %s155_s29, 0 }
   0xb   : > { %p1029_p8 = por %p177_p5, %p176_p3  ;;  %p223_p9 = scmp.lt.s32.totalorder %s948_s23, 3 }
   0xc   : > { %s1035_s6 = scalar_select %p158_p7, %s936_s20, %s160_s27  }
   0xd   : > { %p224_p10 = pnand %p716_p6, %p223_p9 }
   0xe   : > { %v289_v0 = vld [vmem:[%s1137_s1] sm:$0xf] (!%p224_p10)  ;;  %vm310_vm0 = vcmask (!%p224_p10), 1042432   ;;  %vm311_vm1 = vcmask (!%p224_p10), 1043456   ;;  %p259_p11 = scmp.lt.s32.totalorder (!%p224_p10), %s940_s21, 1  ;;  %v950_v1 = vmov (!%p224_p10), 65535  }
   0xf   : > { %227 = sbr.rel (%p224_p10) target bundleno = 508 (0x1fc), region = 40  ;;  %v312_v2 = vsel (!%p224_p10), %vm310_vm0, 4294967295, %v950_v1  ;;  %v862_v4 = vld [vmem:[%s1139_s3] sm:$0xff] (!%p224_p10)   ;;  %v863_v6 = vld [vmem:[%s1139_s3 + $0x8] sm:$0xff] (!%p224_p10)   ;;  %vm297_vm2 = vcmask (!%p224_p10), 56320   ;;  %v864_v16 = vld [vmem:[%s1139_s3 + $0x10] sm:$0xff] (!%p224_p10)  }
  0x10   : > { %v313_v3 = vsel (!%p224_p10), %vm311_vm1, %v312_v2, 0  ;;  %790 = vmatprep.subr.bf16.mxu1 (!%p224_p10), %v862_v4  ;;  %v865_v19 = vld [vmem:[%s1139_s3 + $0x18] sm:$0xff] (!%p224_p10)   ;;  %v866_v21 = vld [vmem:[%s1139_s3 + $0x20] sm:$0xff] (!%p224_p10)   ;;  %v867_v22 = vld [vmem:[%s1139_s3 + $0x28] sm:$0xff] (!%p224_p10)   ;;  %vm595_vm3 = vcmask (!%p224_p10), 1041409   ;;  %vm597_vm4 = vcmask (!%p224_p10), 1042434  }
  0x11   : > { %v315_v5 = vand.u32 (!%p224_p10), %v313_v3, %v289_v0  ;;  %798 = vmatpush3.bf16.msra.mxu1 (!%p224_p10), %v862_v4  ;;  %v868_v23 = vld [vmem:[%s1139_s3 + $0x30] sm:$0xff] (!%p224_p10)   ;;  %v869_v24 = vld [vmem:[%s1139_s3 + $0x38] sm:$0xff] (!%p224_p10)   ;;  %v720_v25 = vld [vmem:[%s1138_s2] ss:$0 sm:$0xff] (!%p224_p10)  ;;  %s255_s25 = sand.u32 (!%p224_p10), 1, %s932_s19   ;;  %vm599_vm5 = vcmask (!%p224_p10), 1043459  }
  0x12   : > { %791 = vmatprep.subr.bf16.mxu1 (!%p224_p10), %v863_v6  ;;  %v725_v54 = vld [vmem:[%s1140_s4] ss:$0 sm:$0xff] (!%p224_p10)  ;;  %s717_s27 = sshll.u32 (!%p224_p10), %s255_s25, 3  ;;  %vm601_vm6 = vcmask (!%p224_p10), 1044484   ;;  %vm603_vm7 = vcmask (!%p224_p10), 1045509   ;;  %vm605_vm8 = vcmask (!%p224_p10), 1046534  }
  0x13   : > { %756 = vmatprep.subr.bf16.mxu0 (!%p224_p10), %v315_v5  ;;  %s735_s29 = sshll.u32 (!%p224_p10), %s940_s21, 7  ;;  %s257_s7 = scalar_lea.vmem (!%p224_p10), [#allocation3], %s717_s27  ;;  %vm607_vm9 = vcmask (!%p224_p10), 1047559  }
  0x14   : > { %757 = vmatpush3.bf16.msra.mxu0 (!%p224_p10), %v315_v5  ;;  %s632_s8 = sshll.u32 (!%p224_p10), %s257_s7, 4  ;;  %s1087_s11 = scalar_lea.hbm (!%p224_p10), %s1141_s5, %s735_s29  ;;  %s1089_s8 = int_to_ptr.vmem [resolvable:$true] %s632_s8 }
  0x15   : > { %766 = vmatprep.subr.bf16.mxu0 (!%p224_p10), %v862_v4  ;;  %799 = vmatpush3.bf16.msra.mxu1 (!%p224_p10), %v863_v6  ;;  %s951_s13 = smov (!%p224_p10), [#allocation3]  }
  0x16   : > { %s260_s9 = scalar_select %p259_p11, %s940_s21, 1  ;;  %792 = vmatprep.subr.bf16.mxu1 %v864_v16 }
  0x17   : > { %s618_s21 = scalar_lea.sflag [#allocation4], %s255_s25  ;;  %s874_s14 = sshll.u32 %s951_s13, 4  ;;  %s875_s14 = int_to_ptr.vmem [resolvable:$false] %s874_s14 }
  0x18   : > { %s738_s12 = sshll.u32 %s260_s9, 6  ;;  %s876_s15 = scalar_lea.vmem %s875_s14, 256 }
  0x19   : > { %s269_s17 = scalar_lea.vmem %s1136_s0, %s738_s12  ;;  %800 = vmatpush3.bf16.msra.mxu1 %v864_v16  ;;  %s870_s12 = scalar_lea.vmem %s1089_s8, 128 }
  0x1a   : > { %v277_v7 = vld [vmem:[%s269_s17] sm:$0xff]  ;;  %v278_v8 = vld [vmem:[%s269_s17 + $0x8] sm:$0xff]  ;;  %v279_v9 = vld [vmem:[%s269_s17 + $0x10] sm:$0xff]  ;;  %793 = vmatprep.subr.bf16.mxu1 %v865_v19  ;;  %p871_p12 = scmp.ne.s32.totalorder %s1089_s8, %s870_s12  ;;  %p877_p1 = scmp.lt.s32.totalorder %s1089_s8, %s875_s14 }
  0x1b   : > { %v285_v10 = vpack.c.bf16 %v278_v8, %v277_v7  ;;  %v280_v11 = vld [vmem:[%s269_s17 + $0x18] sm:$0xff]  ;;  %v281_v12 = vld [vmem:[%s269_s17 + $0x20] sm:$0xff]  ;;  %v282_v13 = vld [vmem:[%s269_s17 + $0x28] sm:$0xff]  ;;  %p878_p2 = scmp.lt.s32.totalorder %s876_s15, %s870_s12 }
  0x1c   : > { %v286_v14 = vpack.c.bf16 %v280_v11, %v279_v9  ;;  %v287_v15 = vpack.c.bf16 %v282_v13, %v281_v12  ;;  %v283_v17 = vld [vmem:[%s269_s17 + $0x30] sm:$0xff]  ;;  %v284_v18 = vld [vmem:[%s269_s17 + $0x38] sm:$0xff]  ;;  %p872_p13 = pnand %p871_p12, %p1022_p4 }
  0x1d   : > { %758 = vmatprep.mubr.msk.bf16.mxu0 %vm297_vm2, %v285_v10  ;;  %v288_v20 = vpack.c.bf16 %v284_v18, %v283_v17  ;;  %801 = vmatpush3.bf16.msra.mxu1 %v865_v19  ;;  %p879_p3 = por %p878_p2, %p877_p1 }
  0x1e   : > { %759 = vmatmul.mubr.msk.bf16.vlgmr.msra.gmra.mrb[0].mxu0 %vm297_vm2, %v286_v14  ;;  %794 = vmatprep.subr.bf16.mxu1 %v866_v21  ;;  %p873_p0 = pneg %p872_p13 }
  0x1f   : > { %762 = vmatprep.mubr.msk.bf16.mxu0 %vm297_vm2, %v287_v15  ;;  %767 = vmatpush3.bf16.msra.mxu0 %v862_v4 }
  0x20   : > { %768 = vmatprep.subr.bf16.mxu0 %v863_v6  ;;  %p880_p5 = pnand %p879_p3, %p873_p0 }
  0x21   : > { %802 = vmatpush3.bf16.msra.mxu1 %v866_v21 }
  0x22   : > { %795 = vmatprep.subr.bf16.mxu1 %v867_v22 }
  0x23   : > { %769 = vmatpush3.bf16.msra.mxu0 %v863_v6 }
  0x24   : > { %770 = vmatprep.subr.bf16.mxu0 %v864_v16 }
  0x25   : > { %803 = vmatpush3.bf16.msra.mxu1 %v867_v22 }
  0x26   : > { %763 = vmatmul.mubr.msk.bf16.gmra.mrb[4].mxu0 %vm297_vm2, %v288_v20  ;;  %796 = vmatprep.subr.bf16.mxu1 %v868_v23 }
  0x27   : > { %771 = vmatpush3.bf16.msra.mxu0 %v864_v16 }
  0x28   : > { %772 = vmatprep.subr.bf16.mxu0 %v865_v19 }
  0x29   : > { %804 = vmatpush3.bf16.msra.mxu1 %v868_v23 }
  0x2a   : > { %797 = vmatprep.subr.bf16.mxu1 %v869_v24 }
  0x2b   : > { %773 = vmatpush3.bf16.msra.mxu0 %v865_v19 }
  0x2c   : > { %774 = vmatprep.subr.bf16.mxu0 %v866_v21 }
  0x2d   : > { %805 = vmatpush3.bf16.msra.mxu1 %v869_v24 }
  0x2f   : > { %775 = vmatpush3.bf16.msra.mxu0 %v866_v21 }
  0x30   : > { %776 = vmatprep.subr.bf16.mxu0 %v867_v22 }
  0x33   : > { %777 = vmatpush3.bf16.msra.mxu0 %v867_v22 }
  0x34   : > { %778 = vmatprep.subr.bf16.mxu0 %v868_v23 }
  0x37   : > { %779 = vmatpush3.bf16.msra.mxu0 %v868_v23 }
  0x38   : > { %780 = vmatprep.subr.bf16.mxu0 %v869_v24 }
  0x3b   : > { %781 = vmatpush3.bf16.msra.mxu0 %v869_v24 }
  0xf1   : > { %v760_v26 = vpop.f32.mrb[0].mxu0 }
  0xf2   : > { %v360_v27 = vadd.f32 %v760_v26, %v720_v25  ;;  %v351_v28 = vpop.f32.mrb[1].mxu0 }
  0xf3   : > { %v352_v29 = vadd.f32 %v720_v25, %v351_v28  ;;  %v761_v30 = vpop.f32.mrb[2].mxu0 }
  0xf4   : > { %v363_v31 = vadd.f32 %v761_v30, %v720_v25  ;;  %v354_v32 = vpop.f32.mrb[3].mxu0  ;;  %v384_v34 = vmax.f32 %v360_v27, 0.0 }
  0xf5   : > { %v355_v33 = vadd.f32 %v720_v25, %v354_v32  ;;  %v382_v36 = vmax.f32 %v352_v29, 0.0 }
  0xf6   : > { %v385_v35 = vmax.f32 %v363_v31, 0.0 }
  0xf7   : > { %v383_v37 = vmax.f32 %v355_v33, 0.0 }
  0xf8   : > { %v391_v38 = vpack.c.bf16 %v385_v35, %v384_v34 }
  0xf9   : > { %v390_v39 = vpack.c.bf16 %v383_v37, %v382_v36  ;;  %v764_v40 = vpop.f32.mrb[4].mxu0 }
  0xfa   : > { %v376_v41 = vadd.f32 %v764_v40, %v720_v25  ;;  %v367_v42 = vpop.f32.mrb[5].mxu0 }
  0xfb   : > { %v368_v43 = vadd.f32 %v720_v25, %v367_v42  ;;  %v765_v44 = vpop.f32.mrb[6].mxu0  ;;  %782 = vmatprep.mubr.bf16.mxu0 %v390_v39 }
  0xfc   : > { %v379_v45 = vadd.f32 %v765_v44, %v720_v25  ;;  %v370_v46 = vpop.f32.mrb[7].mxu0  ;;  %783 = vmatmul.mubr.bf16.vlgmr.msra.gmra.mrb[8].mxu0 %v391_v38  ;;  %v388_v48 = vmax.f32 %v376_v41, 0.0 }
  0xfd   : > { %v371_v47 = vadd.f32 %v720_v25, %v370_v46  ;;  %v386_v50 = vmax.f32 %v368_v43, 0.0 }
  0xfe   : > { %v389_v49 = vmax.f32 %v379_v45, 0.0 }
  0xff   : > { %v387_v51 = vmax.f32 %v371_v47, 0.0 }
 0x100   : > { %v393_v52 = vpack.c.bf16 %v389_v49, %v388_v48 }
 0x101   : > { %v392_v53 = vpack.c.bf16 %v387_v51, %v386_v50 }
 0x103   : > { %786 = vmatprep.mubr.bf16.mxu1 %v392_v53 }
 0x104   : > { %787 = vmatmul.mubr.bf16.vlgmr.msra.gmra.mrb[0].mxu1 %v393_v52 }
 0x1cf   : > { %v784_v55 = vpop.f32.mrb[8].mxu0 }
 0x1d0   : > { %v508_v56 = vadd.f32 %v784_v55, %v725_v54  ;;  %v499_v57 = vpop.f32.mrb[9].mxu0 }
 0x1d1   : > { %v500_v58 = vadd.f32 %v725_v54, %v499_v57  ;;  %v785_v59 = vpop.f32.mrb[10].mxu0 }
 0x1d2   : > { %v532_v60 = vmax.f32 %v508_v56, 0.0  ;;  %v511_v61 = vadd.f32 %v785_v59, %v725_v54  ;;  %v502_v62 = vpop.f32.mrb[11].mxu0 }
 0x1d3   : > { %v530_v63 = vmax.f32 %v500_v58, 0.0  ;;  %v503_v0 = vadd.f32 %v725_v54, %v502_v62 }
 0x1d4   : > { %v550_v1 = vrot.slane %v532_v60, 4  ;;  %v533_v2 = vmax.f32 %v511_v61, 0.0 }
 0x1d5   : > { %v538_v3 = vrot.slane %v530_v63, 4  ;;  %v531_v4 = vmax.f32 %v503_v0, 0.0 }
 0x1d6   : > { %v551_v5 = vmax.f32 %v532_v60, %v550_v1  ;;  %v556_v6 = vrot.slane %v533_v2, 4 }
 0x1d7   : > { %v539_v7 = vmax.f32 %v530_v63, %v538_v3  ;;  %v544_v8 = vrot.slane %v531_v4, 4  ;;  %v788_v9 = vpop.f32.mrb[0].mxu1 }
 0x1d8   : > { %v552_v10 = vrot.slane %v551_v5, 2  ;;  %v557_v11 = vmax.f32 %v533_v2, %v556_v6  ;;  %v524_v12 = vadd.f32 %v788_v9, %v725_v54  ;;  %v515_v13 = vpop.f32.mrb[1].mxu1 }
 0x1d9   : > { %v540_v14 = vrot.slane %v539_v7, 2  ;;  %v545_v15 = vmax.f32 %v531_v4, %v544_v8  ;;  %v516_v16 = vadd.f32 %v725_v54, %v515_v13  ;;  %v789_v17 = vpop.f32.mrb[2].mxu1 }
 0x1da   : > { %v553_v18 = vmax.f32 %v551_v5, %v552_v10  ;;  %v558_v19 = vrot.slane %v557_v11, 2  ;;  %v536_v20 = vmax.f32 %v524_v12, 0.0  ;;  %v527_v21 = vadd.f32 %v789_v17, %v725_v54  ;;  %v518_v22 = vpop.f32.mrb[3].mxu1 }
 0x1db   : > { %v541_v23 = vmax.f32 %v539_v7, %v540_v14  ;;  %v546_v24 = vrot.slane %v545_v15, 2  ;;  %v534_v25 = vmax.f32 %v516_v16, 0.0  ;;  %v519_v26 = vadd.f32 %v725_v54, %v518_v22 }
 0x1dc   : > { %v559_v27 = vmax.f32 %v557_v11, %v558_v19  ;;  %v574_v28 = vrot.slane %v536_v20, 4  ;;  %v537_v29 = vmax.f32 %v527_v21, 0.0  ;;  %v554_v34 = vrot.slane %v553_v18, 1 }
 0x1dd   : > { %v542_v30 = vrot.slane %v541_v23, 1  ;;  %v547_v31 = vmax.f32 %v545_v15, %v546_v24  ;;  %v562_v32 = vrot.slane %v534_v25, 4  ;;  %v535_v33 = vmax.f32 %v519_v26, 0.0 }
 0x1de   : > { %v575_v35 = vmax.f32 %v536_v20, %v574_v28  ;;  %v580_v36 = vrot.slane %v537_v29, 4  ;;  %v560_v37 = vrot.slane %v559_v27, 1  ;;  %v555_v47 = vmax.f32 %v553_v18, %v554_v34 }
 0x1df   : > { %v548_v38 = vrot.slane %v547_v31, 1  ;;  %v563_v39 = vmax.f32 %v534_v25, %v562_v32  ;;  %v568_v40 = vrot.slane %v535_v33, 4  ;;  %v543_v43 = vmax.f32 %v541_v23, %v542_v30 }
 0x1e0   : > { %v576_v41 = vrot.slane %v575_v35, 2  ;;  %v581_v42 = vmax.f32 %v537_v29, %v580_v36  ;;  %v561_v50 = vmax.f32 %v559_v27, %v560_v37 }
 0x1e1   : > { %v549_v44 = vmax.f32 %v547_v31, %v548_v38  ;;  %v564_v45 = vrot.slane %v563_v39, 2  ;;  %v569_v46 = vmax.f32 %v535_v33, %v568_v40 }
 0x1e2   : > { %v577_v48 = vmax.f32 %v575_v35, %v576_v41  ;;  %v582_v49 = vrot.slane %v581_v42, 2 }
 0x1e3   : > { %v596_v51 = vsel %vm595_vm3, %v549_v44, %v543_v43  ;;  %v565_v52 = vmax.f32 %v563_v39, %v564_v45  ;;  %v570_v53 = vrot.slane %v569_v46, 2 }
 0x1e4   : > { %v598_v54 = vsel %vm597_vm4, %v555_v47, %v596_v51  ;;  %v583_v55 = vmax.f32 %v581_v42, %v582_v49  ;;  %v578_v59 = vrot.slane %v577_v48, 1 }
 0x1e5   : > { %v566_v56 = vrot.slane %v565_v52, 1  ;;  %v571_v57 = vmax.f32 %v569_v46, %v570_v53  ;;  %v600_v58 = vsel %vm599_vm5, %v561_v50, %v598_v54 }
 0x1e6   : > { %v584_v61 = vrot.slane %v583_v55, 1  ;;  %v579_v1 = vmax.f32 %v577_v48, %v578_v59 }
 0x1e7   : > { %v567_v60 = vmax.f32 %v565_v52, %v566_v56  ;;  %v572_v62 = vrot.slane %v571_v57, 1 }
 0x1e8   : > { %v585_v2 = vmax.f32 %v583_v55, %v584_v61 }
 0x1e9   : > { %v573_v63 = vmax.f32 %v571_v57, %v572_v62  ;;  %v602_v0 = vsel %vm601_vm6, %v567_v60, %v600_v58 }
 0x1eb   : > { %v604_v3 = vsel %vm603_vm7, %v573_v63, %v602_v0 }
 0x1ec   : > { %v606_v4 = vsel %vm605_vm8, %v579_v1, %v604_v3 }
 0x1ed   : > { %v608_v5 = vsel %vm607_vm9, %v585_v2, %v606_v4 }
 0x1ee   : > { %616 = vst [vmem:[%s257_s7] sm:$0xff] %v608_v5 }
 0x1ef   : > { %883 = shalt.err (!%p880_p5)
}
 0x1f0   : > { %s884_s16 = scalar_lea.hbm %s1087_s11, 128  ;;  %s888_s25 = scalar_lea.hbm %s1141_s5, 256 }
 0x1f1   : > { %p885_p6 = scmp.ne.s32.totalorder %s1087_s11, %s884_s16  ;;  %p889_p10 = scmp.lt.u32.totalorder %s1087_s11, %s1141_s5 }
 0x1f2   : > { %p890_p11 = scmp.lt.u32.totalorder %s888_s25, %s884_s16  ;;  %p892_p13 = scmp.lt.u32.totalorder %s884_s16, %s1087_s11 }
 0x1f3   : > { %p886_p7 = pnand %p885_p6, %p1022_p4 }
 0x1f4   : > { %p891_p12 = por %p890_p11, %p889_p10 }
 0x1f5   : > { %p887_p9 = pneg %p886_p7 }
 0x1f6   : > { %p893_p0 = por %p892_p13, %p891_p12 }
 0x1f8   : > { %p894_p1 = pnand %p893_p0, %p887_p9 }
 0x1fa   : > { %897 = shalt.err (!%p894_p1)
}
 0x1fb   : > { %806 = dma.vmem_to_hbm [thread:$0]  (%p1022_p4), %s1089_s8, 128, %s1087_s11, %s618_s21  }
 0x1fc PF: > { %p812_p2 = scmp.ge.s32.totalorder %s948_s23, 2  ;;  %s644_s7 = sand.u32 1, %s928_s18  }
 0x1fd   : > { %s645_s9 = scalar_lea.sflag [#allocation4], %s644_s7 }
 0x1fe   : > { %p809_p3 = pnand %p812_p2, %p1029_p8 }
 0x200   : > { %923 = dma.done.wait (!%p809_p3), %s645_s9, 128  }
 0x201   : > { %925 = vsyncadd (!%p809_p3), %s645_s9, 4294967168  ;;  %s18_s23 = sadd.s32 1, %s948_s23   ;;  %s1144_s18 = smov %s932_s19 }
 0x202   : > { %p15_p5 = scmp.ge.s32.totalorder %s18_s23, 4   ;;  %s1145_s19 = smov %s936_s20 }
 0x203   : > { %s1146_s20 = smov %s1035_s6  ;;  %s1147_s21 = smov %s944_s22 }
 0x204   : > { %s1148_s22 = smov %s1150_s26  ;;  %17 = sbr.rel (!%p15_p5) target bundleno = 4 (0x4), region = 83 }
 0x20b   :  { %650 = vsyncpa [#allocation4], 1 }
 0x20c   :  { %652 = vsyncpa [#allocation4 + $0x1], 1 }

</bundles_post_ra>
